<compile_context>
chip_gen: v7x
topology: tpu7x:2x2x1
jax: 0.10.0
libtpu: 0.0.40
codegen_flags: <defaults>
</compile_context>

<pallas_src>
import jax
import jax.numpy as jnp
from jax import lax
from jax.experimental import pallas as pl
from jax.experimental.pallas import tpu as pltpu


def _loss_kernel(scores_ref, targets_ref, nfeat_ref, ftile_ref, out_ref):
    j = pl.program_id(0)
    h, _ = nfeat_ref.shape
    tile_b = ftile_ref.shape[0]
    num_nn_tiles = h // tile_b          # tiles [0, num_nn_tiles) are n-vs-n

    sub = lax.broadcasted_iota(jnp.int32, out_ref.shape, 0)
    lane = lax.broadcasted_iota(jnp.int32, out_ref.shape, 1)

    n_bf = nfeat_ref[...]               # (h, D) bf16, resident across the grid
    rt_bf = ftile_ref[...]              # (tile_b, D) bf16 streaming column tile

    # Gram on the MXU: contract D against D (A @ B.T form), f32 accumulate.
    gram = lax.dot_general(
        n_bf, rt_bf,
        dimension_numbers=(((1,), (1,)), ((), ())),
        preferred_element_type=jnp.float32)                     # (h, tile_b)

    # Sums of squares in f32 on the VPU.  xx is recomputed per tile instead of
    # cached in scratch so the grid axis stays safely "parallel" on v7x (a
    # j==0 scratch init would never execute on the second TensorCore); the
    # h*D mul+add rides under the h*tile_b*D MXU work.
    n_f32 = n_bf.astype(jnp.float32)
    xx = jnp.sum(n_f32 * n_f32, axis=1, keepdims=True)          # (h, 1)
    rt_f32 = rt_bf.astype(jnp.float32)
    yy_row = jnp.sum(rt_f32 * rt_f32, axis=1, keepdims=True).T  # (1, tile_b)

    # d2[i, k] = xx[i] + yy[k] - 2*gram[i, k]; yy[k] is constant along the
    # reduction axis i, so reduce (xx - 2*gram) first and add yy to the
    # reduced (1, tile_b) row (max/min commute with the constant shift and
    # with the monotone clamp+sqrt applied afterwards).
    t_mat = xx - 2.0 * gram                                     # (h, tile_b)

    @pl.when(j < num_nn_tiles)
    def _():  # n-vs-n tile: sum_k max_i ||n_i - n_k||  (self-distance 0 is harmless for max)
        d2 = jnp.maximum(jnp.max(t_mat, axis=0, keepdims=True) + yy_row, 0.0)
        part = jnp.sum(jnp.sqrt(d2))
        out_ref[...] = jnp.where((sub == 0) & (lane == 1), part, 0.0)

    @pl.when(j >= num_nn_tiles)
    def _():  # n-vs-a tile: sum_k max(0, margin - min_i ||n_i - a_k||), margin = 100
        d2 = jnp.maximum(jnp.min(t_mat, axis=0, keepdims=True) + yy_row, 0.0)
        part = jnp.sum(jnp.maximum(0.0, 100.0 - jnp.sqrt(d2)))
        out_ref[...] = jnp.where((sub == 0) & (lane == 1), part, 0.0)

    # BCEWithLogitsLoss partial sum (stable form): tiny, done once on the first
    # tile and merged into lane 0 of that tile's partial row.
    @pl.when(j == 0)
    def _():
        x = scores_ref[...]
        t = targets_ref[...]
        bce = jnp.maximum(x, 0.0) - x * t + jnp.log(1.0 + jnp.exp(-jnp.abs(x)))
        out_ref[...] = jnp.where((sub == 0) & (lane == 0), jnp.sum(bce), out_ref[...])


def _pick_tile_b(h, cap=512):
    """Largest divisor of h usable as the column-tile height (MXU-friendly first)."""
    for cand in (512, 384, 256, 128):
        if cand <= cap and cand <= h and h % cand == 0:
            return cand
    best = 8
    for cand in range(8, min(h, cap) + 1, 8):
        if h % cand == 0:
            best = cand
    return best


def _lane_dense(v):
    """Reshape a length-B vector into a lane/sublane-friendly 2-D block."""
    b = v.shape[0]
    if b % 128 == 0:
        return v.reshape(b // 128, 128)
    if b % 8 == 0:
        return v.reshape(8, b // 8)
    return v.reshape(1, b)


def loss_forward(scores, feats, targets, alpha=0.01, beta=0.4):
    """Reproduces Loss.forward: returns (loss_ce, alpha * loss_triplet)."""
    del beta  # ContrastiveLoss result is discarded by the reference forward.
    B, D = feats.shape
    assert B % 16 == 0, "batch must be a multiple of 16 (h = B//2 sublane-aligned)"
    h = B // 2
    tile_b = _pick_tile_b(h)
    num_tiles = B // tile_b

    scores2 = _lane_dense(scores.astype(jnp.float32))
    targets2 = _lane_dense(targets.astype(jnp.float32))
    feats_bf = feats.astype(jnp.bfloat16)   # halve the streamed HBM read

    # Explicit VMEM budget: resident anchors + 2-deep pipelined column tile +
    # pipelined partial-sum blocks + scores/targets + in-kernel f32 temporaries.
    est = (2 * h * D * 2                 # resident bf16 anchors (x2 headroom)
           + 2 * 2 * tile_b * D          # double-buffered bf16 column tile
           + 2 * 8 * 128 * 4             # partial-sum output blocks
           + 2 * 2 * scores2.size * 4    # scores + targets
           + 4 * h * tile_b * 4          # gram / t_mat / reduction temporaries
           + 4 * (h + tile_b) * 4)
    vmem_limit = int(min(max(2 * est + (2 << 20), 16 << 20), 64 << 20))

    out = pl.pallas_call(
        _loss_kernel,
        out_shape=jax.ShapeDtypeStruct((num_tiles * 8, 128), jnp.float32),
        grid=(num_tiles,),
        in_specs=[
            pl.BlockSpec(scores2.shape, lambda j: (0, 0)),     # resident
            pl.BlockSpec(targets2.shape, lambda j: (0, 0)),    # resident
            pl.BlockSpec((h, D), lambda j: (0, 0)),            # resident anchors
            pl.BlockSpec((tile_b, D), lambda j: (j, 0)),       # streaming tile
        ],
        out_specs=pl.BlockSpec((8, 128), lambda j: (j, 0)),
        compiler_params=pltpu.CompilerParams(
            dimension_semantics=("parallel",),
            vmem_limit_bytes=vmem_limit),
    )(scores2, targets2, feats_bf, feats_bf)

    loss_ce = jnp.sum(out[:, 0]) / scores.size
    # mean(n_d_max) over h cols + mean(margin hinge) over h cols -> common /h.
    loss_triplet = jnp.sum(out[:, 1]) / h
    return loss_ce, alpha * loss_triplet


if __name__ == "__main__":
    key = jax.random.PRNGKey(0)
    k_scores, k_feats, k_targets = jax.random.split(key, 3)

    B, D = 256, 128
    scores = jax.random.normal(k_scores, (B,), dtype=jnp.float32)
    feats = jax.random.normal(k_feats, (B, D), dtype=jnp.float32)
    # binary targets (BCE targets double as contrastive labels in the reference)
    targets = jax.random.bernoulli(k_targets, p=0.5, shape=(B,)).astype(jnp.float32)

    loss_ce, loss_triplet_scaled = loss_forward(scores, feats, targets, alpha=0.01)
    jax.block_until_ready((loss_ce, loss_triplet_scaled))
    print("KERNEL_OK")
</pallas_src>

<mosaic_0001>
module attributes {stable_mosaic.version = 11 : i64} {
  func.func @_loss_kernel(%arg0: i32, %arg1: memref<2x128xf32, #tpu.memory_space<vmem>>, %arg2: memref<2x128xf32, #tpu.memory_space<vmem>>, %arg3: memref<128x128xbf16, #tpu.memory_space<vmem>>, %arg4: memref<128x128xbf16, #tpu.memory_space<vmem>>, %arg5: memref<8x128xf32, #tpu.memory_space<vmem>>) attributes {dimension_semantics = [#tpu.dimension_semantics<parallel>], iteration_bounds = array<i64: 2>, scalar_prefetch = 0 : i64, scratch_operands = 0 : i64, tpu.core_type = #tpu.core_type<tc>, window_params = [{pipeline_mode = #tpu.pipeline_mode<synchronous>, transform_indices = @transform_0, window_bounds = array<i64: 2, 128>}, {pipeline_mode = #tpu.pipeline_mode<synchronous>, transform_indices = @transform_1, window_bounds = array<i64: 2, 128>}, {transform_indices = @transform_2, window_bounds = array<i64: 128, 128>}, {transform_indices = @transform_3, window_bounds = array<i64: 128, 128>}, {transform_indices = @transform_4, window_bounds = array<i64: 8, 128>}]} {
    %0 = tpu.iota {dimensions = array<i32: 0>} : vector<8x128xi32>
    %1 = tpu.iota {dimensions = array<i32: 1>} : vector<8x128xi32>
    %c0 = arith.constant 0 : index
    %c0_0 = arith.constant 0 : index
    %2 = vector.load %arg3[%c0, %c0_0] : memref<128x128xbf16, #tpu.memory_space<vmem>>, vector<128x128xbf16>
    %c0_1 = arith.constant 0 : index
    %c0_2 = arith.constant 0 : index
    %3 = vector.load %arg4[%c0_1, %c0_2] : memref<128x128xbf16, #tpu.memory_space<vmem>>, vector<128x128xbf16>
    %cst = arith.constant dense<0.000000e+00> : vector<128x128xf32>
    %4 = tpu.matmul %2, %3, %cst {dimension_numbers = #tpu.dot_dimension_numbers<[1], [1], [0], [0], [0, 0, 1, 0], [], []>} : vector<128x128xbf16>, vector<128x128xbf16>, vector<128x128xf32> -> vector<128x128xf32>
    %5 = arith.extf %2 : vector<128x128xbf16> to vector<128x128xf32>
    %6 = arith.mulf %5, %5 : vector<128x128xf32>
    %cst_3 = arith.constant dense<0.000000e+00> : vector<128xf32>
    %7 = vector.multi_reduction <add>, %6, %cst_3 [1] : vector<128x128xf32> to vector<128xf32>
    %8 = vector.shape_cast %7 : vector<128xf32> to vector<128x1xf32>
    %9 = arith.extf %3 : vector<128x128xbf16> to vector<128x128xf32>
    %10 = arith.mulf %9, %9 : vector<128x128xf32>
    %cst_4 = arith.constant dense<0.000000e+00> : vector<128xf32>
    %11 = vector.multi_reduction <add>, %10, %cst_4 [1] : vector<128x128xf32> to vector<128xf32>
    %12 = vector.shape_cast %11 : vector<128xf32> to vector<128x1xf32>
    %13 = tpu.transpose %12, [1, 0] : vector<128x1xf32> -> vector<1x128xf32>
    %cst_5 = arith.constant 2.000000e+00 : f32
    %14 = vector.broadcast %cst_5 : f32 to vector<128x128xf32>
    %15 = arith.mulf %14, %4 : vector<128x128xf32>
    %16 = vector.broadcast %8 : vector<128x1xf32> to vector<128x128xf32>
    %17 = arith.subf %16, %15 : vector<128x128xf32>
    %c1_i32 = arith.constant 1 : i32
    %18 = arith.cmpi slt, %arg0, %c1_i32 : i32
    %19 = arith.extui %18 : i1 to i32
    %c0_i32 = arith.constant 0 : i32
    %20 = arith.cmpi ne, %19, %c0_i32 : i32
    scf.if %20 {
      %cst_10 = arith.constant dense<0xFF800000> : vector<128xf32>
      %27 = vector.multi_reduction <maximumf>, %17, %cst_10 [0] : vector<128x128xf32> to vector<128xf32>
      %28 = vector.shape_cast %27 : vector<128xf32> to vector<1x128xf32>
      %29 = arith.addf %28, %13 : vector<1x128xf32>
      %cst_11 = arith.constant 0.000000e+00 : f32
      %30 = vector.broadcast %cst_11 : f32 to vector<1x128xf32>
      %31 = arith.maximumf %29, %30 : vector<1x128xf32>
      %32 = math.sqrt %31 : vector<1x128xf32>
      %33 = vector.shape_cast %32 : vector<1x128xf32> to vector<1x1x128xf32>
      %cst_12 = arith.constant dense<0.000000e+00> : vector<1xf32>
      %34 = vector.multi_reduction <add>, %33, %cst_12 [1, 2] : vector<1x1x128xf32> to vector<1xf32>
      %35 = vector.shape_cast %34 : vector<1xf32> to vector<1x1x1xf32>
      %36 = vector.extract %35[0, 0, 0] : f32 from vector<1x1x1xf32>
      %c0_i32_13 = arith.constant 0 : i32
      %37 = vector.broadcast %c0_i32_13 : i32 to vector<8x128xi32>
      %38 = arith.cmpi eq, %0, %37 : vector<8x128xi32>
      %c1_i32_14 = arith.constant 1 : i32
      %39 = vector.broadcast %c1_i32_14 : i32 to vector<8x128xi32>
      %40 = arith.cmpi eq, %1, %39 : vector<8x128xi32>
      %41 = arith.andi %38, %40 : vector<8x128xi1>
      %cst_15 = arith.constant 0.000000e+00 : f32
      %42 = vector.broadcast %36 : f32 to vector<8x128xf32>
      %43 = vector.broadcast %cst_15 : f32 to vector<8x128xf32>
      %44 = arith.select %41, %42, %43 : vector<8x128xi1>, vector<8x128xf32>
      %c0_16 = arith.constant 0 : index
      %c0_17 = arith.constant 0 : index
      %45 = vector.load %arg5[%c0_16, %c0_17] : memref<8x128xf32, #tpu.memory_space<vmem>>, vector<8x128xf32>
      tpu.vector_store %arg5[%c0_16, %c0_17], %44 {strides = array<i32>} : memref<8x128xf32, #tpu.memory_space<vmem>>, vector<8x128xf32>,
    } else {
    }
    %c1_i32_6 = arith.constant 1 : i32
    %21 = arith.cmpi sge, %arg0, %c1_i32_6 : i32
    %22 = arith.extui %21 : i1 to i32
    %c0_i32_7 = arith.constant 0 : i32
    %23 = arith.cmpi ne, %22, %c0_i32_7 : i32
    scf.if %23 {
      %cst_10 = arith.constant dense<0x7F800000> : vector<128xf32>
      %27 = vector.multi_reduction <minimumf>, %17, %cst_10 [0] : vector<128x128xf32> to vector<128xf32>
      %28 = vector.shape_cast %27 : vector<128xf32> to vector<1x128xf32>
      %29 = arith.addf %28, %13 : vector<1x128xf32>
      %cst_11 = arith.constant 0.000000e+00 : f32
      %30 = vector.broadcast %cst_11 : f32 to vector<1x128xf32>
      %31 = arith.maximumf %29, %30 : vector<1x128xf32>
      %32 = math.sqrt %31 : vector<1x128xf32>
      %cst_12 = arith.constant 1.000000e+02 : f32
      %33 = vector.broadcast %cst_12 : f32 to vector<1x128xf32>
      %34 = arith.subf %33, %32 : vector<1x128xf32>
      %cst_13 = arith.constant 0.000000e+00 : f32
      %35 = vector.broadcast %cst_13 : f32 to vector<1x128xf32>
      %36 = arith.maximumf %35, %34 : vector<1x128xf32>
      %37 = vector.shape_cast %36 : vector<1x128xf32> to vector<1x1x128xf32>
      %cst_14 = arith.constant dense<0.000000e+00> : vector<1xf32>
      %38 = vector.multi_reduction <add>, %37, %cst_14 [1, 2] : vector<1x1x128xf32> to vector<1xf32>
      %39 = vector.shape_cast %38 : vector<1xf32> to vector<1x1x1xf32>
      %40 = vector.extract %39[0, 0, 0] : f32 from vector<1x1x1xf32>
      %c0_i32_15 = arith.constant 0 : i32
      %41 = vector.broadcast %c0_i32_15 : i32 to vector<8x128xi32>
      %42 = arith.cmpi eq, %0, %41 : vector<8x128xi32>
      %c1_i32_16 = arith.constant 1 : i32
      %43 = vector.broadcast %c1_i32_16 : i32 to vector<8x128xi32>
      %44 = arith.cmpi eq, %1, %43 : vector<8x128xi32>
      %45 = arith.andi %42, %44 : vector<8x128xi1>
      %cst_17 = arith.constant 0.000000e+00 : f32
      %46 = vector.broadcast %40 : f32 to vector<8x128xf32>
      %47 = vector.broadcast %cst_17 : f32 to vector<8x128xf32>
      %48 = arith.select %45, %46, %47 : vector<8x128xi1>, vector<8x128xf32>
      %c0_18 = arith.constant 0 : index
      %c0_19 = arith.constant 0 : index
      %49 = vector.load %arg5[%c0_18, %c0_19] : memref<8x128xf32, #tpu.memory_space<vmem>>, vector<8x128xf32>
      tpu.vector_store %arg5[%c0_18, %c0_19], %48 {strides = array<i32>} : memref<8x128xf32, #tpu.memory_space<vmem>>, vector<8x128xf32>,
    } else {
    }
    %c0_i32_8 = arith.constant 0 : i32
    %24 = arith.cmpi eq, %arg0, %c0_i32_8 : i32
    %25 = arith.extui %24 : i1 to i32
    %c0_i32_9 = arith.constant 0 : i32
    %26 = arith.cmpi ne, %25, %c0_i32_9 : i32
    scf.if %26 {
      %c0_10 = arith.constant 0 : index
      %c0_11 = arith.constant 0 : index
      %27 = vector.load %arg1[%c0_10, %c0_11] : memref<2x128xf32, #tpu.memory_space<vmem>>, vector<2x128xf32>
      %c0_12 = arith.constant 0 : index
      %c0_13 = arith.constant 0 : index
      %28 = vector.load %arg2[%c0_12, %c0_13] : memref<2x128xf32, #tpu.memory_space<vmem>>, vector<2x128xf32>
      %cst_14 = arith.constant 0.000000e+00 : f32
      %29 = vector.broadcast %cst_14 : f32 to vector<2x128xf32>
      %30 = arith.maximumf %27, %29 : vector<2x128xf32>
      %31 = arith.mulf %27, %28 : vector<2x128xf32>
      %32 = arith.subf %30, %31 : vector<2x128xf32>
      %33 = math.absf %27 : vector<2x128xf32>
      %cst_15 = arith.constant 0.000000e+00 : f32
      %34 = vector.broadcast %cst_15 : f32 to vector<2x128xf32>
      %35 = arith.subf %34, %33 : vector<2x128xf32>
      %36 = math.exp %35 : vector<2x128xf32>
      %cst_16 = arith.constant 1.000000e+00 : f32
      %37 = vector.broadcast %cst_16 : f32 to vector<2x128xf32>
      %38 = arith.addf %37, %36 : vector<2x128xf32>
      %39 = math.log %38 : vector<2x128xf32>
      %40 = arith.addf %32, %39 : vector<2x128xf32>
      %c0_i32_17 = arith.constant 0 : i32
      %41 = vector.broadcast %c0_i32_17 : i32 to vector<8x128xi32>
      %42 = arith.cmpi eq, %0, %41 : vector<8x128xi32>
      %c0_i32_18 = arith.constant 0 : i32
      %43 = vector.broadcast %c0_i32_18 : i32 to vector<8x128xi32>
      %44 = arith.cmpi eq, %1, %43 : vector<8x128xi32>
      %45 = arith.andi %42, %44 : vector<8x128xi1>
      %46 = vector.shape_cast %40 : vector<2x128xf32> to vector<1x2x128xf32>
      %cst_19 = arith.constant dense<0.000000e+00> : vector<1xf32>
      %47 = vector.multi_reduction <add>, %46, %cst_19 [1, 2] : vector<1x2x128xf32> to vector<1xf32>
      %48 = vector.shape_cast %47 : vector<1xf32> to vector<1x1x1xf32>
      %49 = vector.extract %48[0, 0, 0] : f32 from vector<1x1x1xf32>
      %c0_20 = arith.constant 0 : index
      %c0_21 = arith.constant 0 : index
      %50 = vector.load %arg5[%c0_20, %c0_21] : memref<8x128xf32, #tpu.memory_space<vmem>>, vector<8x128xf32>
      %51 = vector.broadcast %49 : f32 to vector<8x128xf32>
      %52 = arith.select %45, %51, %50 : vector<8x128xi1>, vector<8x128xf32>
      %c0_22 = arith.constant 0 : index
      %c0_23 = arith.constant 0 : index
      %53 = vector.load %arg5[%c0_22, %c0_23] : memref<8x128xf32, #tpu.memory_space<vmem>>, vector<8x128xf32>
      tpu.vector_store %arg5[%c0_22, %c0_23], %52 {strides = array<i32>} : memref<8x128xf32, #tpu.memory_space<vmem>>, vector<8x128xf32>,
    } else {
    }
    return
  }
  func.func @transform_0(%arg0: i32) -> (i32, i32) {
    %c0_i32 = arith.constant 0 : i32
    %c0_i32_0 = arith.constant 0 : i32
    %c0_i32_1 = arith.constant 0 : i32
    return %c0_i32, %c0_i32_0 : i32, i32
  }
  func.func @transform_1(%arg0: i32) -> (i32, i32) {
    %c0_i32 = arith.constant 0 : i32
    %c0_i32_0 = arith.constant 0 : i32
    %c0_i32_1 = arith.constant 0 : i32
    return %c0_i32, %c0_i32_0 : i32, i32
  }
  func.func @transform_2(%arg0: i32) -> (i32, i32) {
    %c0_i32 = arith.constant 0 : i32
    %c0_i32_0 = arith.constant 0 : i32
    %c0_i32_1 = arith.constant 0 : i32
    return %c0_i32, %c0_i32_0 : i32, i32
  }
  func.func @transform_3(%arg0: i32) -> (i32, i32) {
    %c0_i32 = arith.constant 0 : i32
    %c0_i32_0 = arith.constant 0 : i32
    return %arg0, %c0_i32 : i32, i32
  }
  func.func @transform_4(%arg0: i32) -> (i32, i32) {
    %c0_i32 = arith.constant 0 : i32
    %c0_i32_0 = arith.constant 0 : i32
    return %arg0, %c0_i32 : i32, i32
  }
}

</mosaic_0001>

<bundles_post_ra>
// kernel: tpu_custom_call.1
= control target key start
LH: loop header
LB: loop body
LE: loop exit
PB: predicated region body
PF: predicated region fallthrough
CT: control target
= control target key end

     0   :  { %s1691_s0 = inlined_call_operand.hbm [shape: f32[2,128], index: 0, kind: input, shape index: {}]   ;;  %s1692_s1 = inlined_call_operand.vmem [shape: f32[2,128], index: 1, kind: input, shape index: {}]   ;;  %s1693_s2 = inlined_call_operand.hbm [shape: bf16[256,128], index: 2, kind: input, shape index: {}]   ;;  %s1694_s3 = inlined_call_operand.hbm [shape: bf16[256,128], index: 3, kind: input, shape index: {}]   ;;  %s1695_s4 = inlined_call_operand.hbm [shape: f32[16,128], index: 4, kind: output, shape index: {}]  }
   0x1   :  { %1701 = sst [smem:[#allocation13_spill]] %s1691_s0 }
   0x2   :  { %9 = vsyncpa [#allocation3], 0 }
   0x3   :  { %10 = vsyncpa [#allocation6], 0 }
   0x4   :  { %11 = vsyncpa [#allocation4], 0 }
   0x5   :  { %13 = vsyncpa [#allocation4 + $0x1], 0  ;;  %s1315_s15 = smov 0   ;;  %s1317_s16 = smov 0  }
   0x6   :  { %s1319_s17 = smov 0   ;;  %s1321_s18 = smov 0  }
   0x7 LB: > { %s1336_s19 = sadd.s32 4294967295, %s1282_s18   ;;  %s906_s20 = sadd.s32 4294967294, %s1282_s18   ;;  %s1282_s18 = sphi %s1321_s18, %s1725_s18   ;;  %s1278_s17 = sphi %s1319_s17, %s1724_s17   ;;  %s1274_s16 = sphi %s1317_s16, %s1723_s16   ;;  %s1270_s15 = sphi %s1315_s15, %s1722_s15  }
   0x8   : > { %s1340_s21 = sadd.s32 1, %s1282_s18   ;;  %s89_s22 = sadd.s32 1, %s1278_s17 }
   0x9   : > { %s86_s23 = ssub.s32 %s1282_s18, %s1340_s21  ;;  %p96_p0 = scmp.ne.s32.totalorder %s1278_s17, %s1274_s16 }
   0xa   : > { %p87_p1 = scmp.eq.s32.totalorder %s86_s23, 0  ;;  %p97_p2 = scmp.eq.s32.totalorder %s1282_s18, 0 }
   0xb   : > { %p102_p3 = scmp.ne.s32.totalorder %s1274_s16, %s1270_s15  ;;  %p1696_p4 = scmp.eq.s32.totalorder %s1336_s19, 0 }
   0xc   : > { %s1352_s24 = scalar_select %p87_p1, %s1278_s17, %s89_s22  }
   0xd   : > { %p1354_p5 = por %p97_p2, %p96_p0  ;;  %p1360_p6 = por %p1696_p4, %p102_p3 }
   0xe   : > { %p126_p7 = scmp.eq.s32.totalorder %s1336_s19, 1  ;;  %p132_p8 = scmp.eq.s32.totalorder %s906_s20, 1 }
   0xf   : > { %s1703_s26 = scalar_select %p1360_p6, 1, 0 }
  0x10   : > { %p907_p9 = scmp.ge.s32.totalorder %s1282_s18, 1  ;;  %p139_p10 = scmp.lt.s32.totalorder %s1282_s18, 3 }
  0x11   : > { %p1367_p11 = por %p126_p7, %p96_p0  ;;  %p1371_p12 = por %p132_p8, %p102_p3 }
  0x12   : > { %p1375_p13 = pnand %p907_p9, %p139_p10  ;;  %s1284_s30 = smov [#allocation2]  }
  0x13   : > { %s1704_s27 = scalar_select %p1367_p11, 1, 0 }
  0x14   : > { %s1705_s28 = scalar_select %p1371_p12, 1, 0 }
  0x15   : > { %s1706_s29 = scalar_select %p1375_p13, 1, 0 }
  0x16   : > { %p1025_p4 = pneg %p1375_p13  ;;  %s152_s5 = sshll.u32 %s1284_s30, 4  ;;  %s153_s5 = int_to_ptr.vmem [resolvable:$true] %s152_s5 }
  0x17   : > { %p1042_p0 = scmp.lt.s32.totalorder %s1282_s18, 2  ;;  %p1707_p7 = scmp.eq.s32.totalorder %s1336_s19, 0 }
  0x18   : > { %s1285_s8 = smov [#allocation5]   ;;  %s1710_s0 = sld [smem:[#allocation13_spill]] }
  0x19   : > { %p1386_p6 = pnand %p1025_p4, %p1707_p7  ;;  %p1392_p3 = pnand %p1042_p0, %p1354_p5 }
  0x1a   : > { %s165_s9 = sshll.u32 %s1285_s8, 4  ;;  %s1396_s9 = int_to_ptr.vmem [resolvable:$true] %s165_s9 }
  0x1b   : > { %s1709_s7 = scalar_select %p1392_p3, 1, 0 }
  0x1c   : > { %p1124_p8 = pneg %p1386_p6 }
  0x1e   : > { %s1122_s12 = scalar_lea.hbm %s1710_s0, 32 }
  0x1f   : > { %p1123_p4 = scmp.ne.s32.totalorder %s1710_s0, %s1122_s12  ;;  %p1129_p10 = scmp.lt.u32.totalorder %s1122_s12, %s1710_s0 }
  0x21   : > { %p1125_p5 = pnand %p1124_p8, %p1123_p4 }
  0x23   : > { %p1126_p9 = pneg %p1125_p5 }
  0x25   : > { %p1131_p0 = pnand %p1129_p10, %p1126_p9 }
  0x27   : > { %1134 = shalt.err (!%p1131_p0)
}
  0x28   : > { %s1135_s23 = scalar_lea.vmem %s153_s5, 32  ;;  %p1143_p12 = scmp.lt.s32.totalorder %s153_s5, %s153_s5 }
  0x29   : > { %p1136_p7 = scmp.ne.s32.totalorder %s153_s5, %s1135_s23  ;;  %p1144_p11 = scmp.lt.s32.totalorder %s1135_s23, %s1135_s23 }
  0x2b   : > { %p1138_p2 = pnand %p1136_p7, %p1124_p8  ;;  %p1145_p13 = por %p1144_p11, %p1143_p12 }
  0x2d   : > { %p1139_p1 = pneg %p1138_p2 }
  0x2f   : > { %p1146_p3 = pnand %p1145_p13, %p1139_p1 }
  0x31   : > { %1149 = shalt.err (!%p1146_p3)
}
  0x32   : > { %1028 = dma.hbm_to_vmem [thread:$0]  (!%p1386_p6), %s1710_s0, 32, %s153_s5, [#allocation3]  }
  0x33   : > { %s179_s8 = sand.u32 1, %s1282_s18   ;;  %s1150_s12 = scalar_lea.hbm %s1693_s2, 1024 }
  0x34   : > { %p1151_p2 = scmp.ne.s32.totalorder %s1693_s2, %s1150_s12  ;;  %s1155_s23 = scalar_lea.hbm %s1693_s2, 2048 }
  0x35   : > { %p1156_p13 = scmp.lt.u32.totalorder %s1155_s23, %s1150_s12  ;;  %p1157_p1 = scmp.lt.u32.totalorder %s1150_s12, %s1693_s2 }
  0x36   : > { %p1153_p11 = pnand %p1151_p2, %p1124_p8 }
  0x37   : > { %p1158_p3 = por %p1157_p1, %p1156_p13 }
  0x38   : > { %p1154_p12 = pneg %p1153_p11 }
  0x3a   : > { %p1159_p4 = pnand %p1158_p3, %p1154_p12 }
  0x3c   : > { %1162 = shalt.err (!%p1159_p4)
}
  0x3d   : > { %s1163_s30 = scalar_lea.vmem %s1396_s9, 1024  ;;  %p1171_p0 = scmp.lt.s32.totalorder %s1396_s9, %s1396_s9 }
  0x3e   : > { %p1164_p5 = scmp.ne.s32.totalorder %s1396_s9, %s1163_s30  ;;  %p1172_p7 = scmp.lt.s32.totalorder %s1163_s30, %s1163_s30 }
  0x40   : > { %p1166_p9 = pnand %p1164_p5, %p1124_p8  ;;  %p1173_p2 = por %p1172_p7, %p1171_p0 }
  0x42   : > { %p1167_p10 = pneg %p1166_p9 }
  0x44   : > { %p1174_p11 = pnand %p1173_p2, %p1167_p10 }
  0x46   : > { %1177 = shalt.err (!%p1174_p11)
}
  0x47   : > { %s1286_s10 = smov 64   ;;  %s1287_s11 = smov 4  }
  0x48   : > { %1031 = dma.hbm_to_vmem [thread:$0]  (!%p1386_p6), %s1693_s2, 1024, %s1396_s9, [#allocation6], %s1286_s10, %s1286_s10, %s1287_s11  }
  0x49   : > { %s181_s14 = sand.u32 1, %s1278_s17   ;;  %s942_s22 = sshll.u32 %s1282_s18, 10 }
  0x4a   : > { %s911_s20 = sshll.u32 %s181_s14, 6  ;;  %s1457_s5 = scalar_lea.hbm %s1694_s3, %s942_s22 }
  0x4b   : > { %s183_s6 = scalar_lea.vmem [#allocation7], %s911_s20  ;;  %s1463_s0 = scalar_lea.sflag [#allocation3], %s179_s8 }
  0x4c   : > { %s190_s30 = sshll.u32 %s183_s6, 4  ;;  %s1178_s9 = scalar_lea.hbm %s1457_s5, 1024  ;;  %s1459_s30 = int_to_ptr.vmem [resolvable:$true] %s190_s30 }
  0x4d   : > { %p1179_p6 = scmp.ne.s32.totalorder %s1457_s5, %s1178_s9  ;;  %p1711_p8 = scmp.ne.s32.totalorder %s1709_s7, 0 }
  0x4e   : > { %s1183_s14 = scalar_lea.hbm %s1694_s3, 2048  ;;  %p1184_p3 = scmp.lt.u32.totalorder %s1457_s5, %s1694_s3 }
  0x4f   : > { %p1180_p12 = pneg %p1711_p8  ;;  %p1185_p4 = scmp.lt.u32.totalorder %s1183_s14, %s1178_s9 }
  0x50   : > { %p1187_p9 = scmp.lt.u32.totalorder %s1178_s9, %s1457_s5 }
  0x51   : > { %p1181_p13 = pnand %p1180_p12, %p1179_p6  ;;  %p1186_p5 = por %p1185_p4, %p1184_p3 }
  0x53   : > { %p1182_p1 = pneg %p1181_p13  ;;  %p1188_p10 = por %p1187_p9, %p1186_p5 }
  0x55   : > { %p1189_p0 = pnand %p1188_p10, %p1182_p1 }
  0x57   : > { %1192 = shalt.err (!%p1189_p0)
}
  0x58   : > { %s1193_s8 = scalar_lea.vmem %s1459_s30, 1024  ;;  %s1288_s23 = smov [#allocation7]  }
  0x59   : > { %p1194_p7 = scmp.ne.s32.totalorder %s1459_s30, %s1193_s8  ;;  %s1198_s25 = sshll.u32 %s1288_s23, 4  ;;  %s1199_s25 = int_to_ptr.vmem [resolvable:$false] %s1198_s25 }
  0x5a   : > { %s1200_s6 = scalar_lea.vmem %s1199_s25, 2048  ;;  %p1201_p6 = scmp.lt.s32.totalorder %s1459_s30, %s1199_s25 }
  0x5b   : > { %p1196_p2 = pnand %p1194_p7, %p1180_p12  ;;  %p1202_p13 = scmp.lt.s32.totalorder %s1200_s6, %s1193_s8 }
  0x5d   : > { %p1197_p11 = pneg %p1196_p2  ;;  %p1203_p3 = por %p1202_p13, %p1201_p6 }
  0x5f   : > { %p1204_p4 = pnand %p1203_p3, %p1197_p11 }
  0x61   : > { %1207 = shalt.err (!%p1204_p4)
}
  0x62   : > { %1035 = dma.hbm_to_vmem [thread:$0]  (!%p1711_p8), %s1457_s5, 1024, %s1459_s30, %s1463_s0, %s1286_s10, %s1286_s10, %s1287_s11  }
  0x63   : > { %p1712_p12 = scmp.ne.s32.totalorder %s1706_s29, 0 }
  0x64   : > { %p1713_p1 = scmp.eq.s32.totalorder (!%p1712_p12), %s1336_s19, 0 }
  0x65   : > { %202 = sbr.rel (%p1712_p12) target bundleno = 1182 (0x49e), region = 36 }
  0x6c   : > { %1253 = dma.done.wait (%p1713_p1), [#allocation3], 32   ;;  %p1714_p5 = pmov %p1713_p1 }
  0x6d   : > { %p1715_p9 = pmov %p1713_p1 }
  0x6e   : > { %1255 = vsyncadd (%p1714_p5), [#allocation3], 4294967264 }
  0x6f   : > { %1257 = dma.done.wait (%p1715_p9), [#allocation6], 1024   ;;  %p1716_p10 = pmov %p1713_p1 }
  0x70   : > { %s212_s7 = sand.u32 1, %s1336_s19   ;;  %s1506_s0 = sand.u32 1, %s1274_s16  }
  0x71   : > { %1259 = vsyncadd (%p1716_p10), [#allocation6], 4294966272  ;;  %s917_s29 = sshll.u32 %s1506_s0, 6  ;;  %s213_s10 = scalar_lea.sflag [#allocation3], %s212_s7 }
  0x72   : > { %s1509_s11 = scalar_lea.vmem [#allocation7], %s917_s29  ;;  %p1717_p8 = scmp.ne.s32.totalorder %s1703_s26, 0 }
  0x74   : > { %1261 = dma.done.wait (%p1717_p8), %s213_s10, 1024  }
  0x75   : > { %1263 = vsyncadd (%p1717_p8), %s213_s10, 4294966272  ;;  %s918_s5 = sshll.u32 %s1506_s0, 3  ;;  %v243_v0 = vlaneseq  ;;  %v263_v3 = vld [vmem:[%s1509_s11] sm:$0xff]   ;;  %v265_v4 = vld [vmem:[%s1509_s11 + $0x8] sm:$0xff]   ;;  %p935_p0 = scmp.ge.s32.totalorder %s1336_s19, 1 }
  0x76   : > { %v536_v5 = vunpack.c.l.bf16 %v263_v3  ;;  %v537_v6 = vunpack.c.h.bf16 %v263_v3  ;;  %v538_v7 = vunpack.c.l.bf16 %v265_v4  ;;  %v539_v8 = vunpack.c.h.bf16 %v265_v4  ;;  %959 = vmatprep.subr.bf16.mxu0 %v263_v3  ;;  %991 = vmatprep.subr.bf16.mxu1 %v263_v3  ;;  %v267_v11 = vld [vmem:[%s1509_s11 + $0x10] sm:$0xff]   ;;  %v1523_v12 = vld [vmem:[#allocation5] sm:$0xff]   ;;  %v269_v18 = vld [vmem:[%s1509_s11 + $0x18] sm:$0xff]   ;;  %s1595_s26 = scalar_lea.vmem [#allocation8], %s918_s5 }
  0x77   : > { %v1516_v1 = vshrl.u32 %v243_v0, 7  ;;  %v1518_v2 = vand.u32 127, %v243_v0  ;;  %960 = vmatpush3.bf16.xpose.msra.mxu0 %v263_v3  ;;  %999 = vmatpush3.bf16.xpose.msra.mxu1 %v263_v3  ;;  %v1525_v13 = vld [vmem:[#allocation5 + $0x20] sm:$0xff]   ;;  %v540_v16 = vunpack.c.l.bf16 %v267_v11  ;;  %v541_v17 = vunpack.c.h.bf16 %v267_v11  ;;  %v273_v28 = vld [vmem:[%s1509_s11 + $0x28] sm:$0xff]   ;;  %v1533_v33 = vld [vmem:[%s1509_s11 + $0x30] sm:$0xff]  }
  0x78   : > { %v552_v9 = vmul.f32 %v536_v5, %v536_v5  ;;  %v554_v10 = vmul.f32 %v538_v7, %v538_v7  ;;  %961 = vmatprep.subr.bf16.mxu0 %v265_v4  ;;  %992 = vmatprep.subr.bf16.mxu1 %v265_v4  ;;  %v553_v14 = vmul.f32 %v537_v6, %v537_v6  ;;  %v542_v21 = vunpack.c.l.bf16 %v269_v18  ;;  %v271_v23 = vld [vmem:[%s1509_s11 + $0x20] sm:$0xff]   ;;  %v1538_v38 = vld [vmem:[%s1509_s11 + $0x38] sm:$0xff]   ;;  %v1544_v47 = vld [vmem:[#allocation5 + $0x8] sm:$0xff]  }
  0x79   : > { %v555_v15 = vmul.f32 %v539_v8, %v539_v8  ;;  %v556_v19 = vmul.f32 %v540_v16, %v540_v16  ;;  %v557_v20 = vmul.f32 %v541_v17, %v541_v17  ;;  %v543_v22 = vunpack.c.h.bf16 %v269_v18  ;;  %975 = vmatprep.mubr.bf16.mxu0 %v1523_v12  ;;  %983 = vmatprep.mubr.bf16.mxu1 %v1525_v13  ;;  %v251_v52 = vld [vmem:[#allocation5 + $0x10] sm:$0xff]   ;;  %v253_v57 = vld [vmem:[#allocation5 + $0x18] sm:$0xff]  }
  0x7a   : > { %568 = vadd.xlane.f32.xlu0 %v552_v9  ;;  %572 = vadd.xlane.f32.xlu1 %v554_v10  ;;  %v558_v24 = vmul.f32 %v542_v21, %v542_v21  ;;  %v544_v26 = vunpack.c.l.bf16 %v271_v23  ;;  %v545_v27 = vunpack.c.h.bf16 %v271_v23  ;;  %v546_v31 = vunpack.c.l.bf16 %v273_v28  ;;  %v259_v9 = vld [vmem:[#allocation5 + $0x30] sm:$0xff]  }
  0x7b   : > { %v559_v25 = vmul.f32 %v543_v22, %v543_v22  ;;  %v547_v32 = vunpack.c.h.bf16 %v273_v28  ;;  %v548_v36 = vunpack.c.l.bf16 %v1533_v33  ;;  %v549_v37 = vunpack.c.h.bf16 %v1533_v33 }
  0x7c   : > { %v560_v29 = vmul.f32 %v544_v26, %v544_v26  ;;  %v561_v30 = vmul.f32 %v545_v27, %v545_v27  ;;  %v562_v34 = vmul.f32 %v546_v31, %v546_v31  ;;  %v550_v41 = vunpack.c.l.bf16 %v1538_v38 }
  0x7d   : > { %v563_v35 = vmul.f32 %v547_v32, %v547_v32  ;;  %v564_v39 = vmul.f32 %v548_v36, %v548_v36  ;;  %v565_v40 = vmul.f32 %v549_v37, %v549_v37  ;;  %v551_v42 = vunpack.c.h.bf16 %v1538_v38 }
  0x7e   : > { %570 = vadd.xlane.f32.xlu0 %v553_v14  ;;  %574 = vadd.xlane.f32.xlu1 %v555_v15  ;;  %v566_v43 = vmul.f32 %v550_v41, %v550_v41  ;;  %v472_v45 = vunpack.c.l.bf16 %v1523_v12  ;;  %v473_v46 = vunpack.c.h.bf16 %v1523_v12  ;;  %v474_v49 = vunpack.c.l.bf16 %v1544_v47  ;;  %v261_v14 = vld [vmem:[#allocation5 + $0x38] sm:$0xff]  }
  0x7f   : > { %962 = vmatpush3.bf16.xpose.msra.mxu0 %v265_v4  ;;  %1000 = vmatpush3.bf16.xpose.msra.mxu1 %v265_v4  ;;  %v567_v44 = vmul.f32 %v551_v42, %v551_v42  ;;  %v475_v51 = vunpack.c.h.bf16 %v1544_v47  ;;  %v476_v54 = vunpack.c.l.bf16 %v251_v52  ;;  %v477_v56 = vunpack.c.h.bf16 %v251_v52  ;;  %v257_v4 = vld [vmem:[#allocation5 + $0x28] sm:$0xff]  }
  0x80   : > { %963 = vmatprep.subr.bf16.mxu0 %v267_v11  ;;  %993 = vmatprep.subr.bf16.mxu1 %v267_v11  ;;  %v488_v48 = vmul.f32 %v472_v45, %v472_v45  ;;  %v489_v50 = vmul.f32 %v473_v46, %v473_v46  ;;  %v490_v53 = vmul.f32 %v474_v49, %v474_v49  ;;  %v478_v59 = vunpack.c.l.bf16 %v253_v57 }
  0x81   : > { %v491_v55 = vmul.f32 %v475_v51, %v475_v51  ;;  %v492_v58 = vmul.f32 %v476_v54, %v476_v54  ;;  %v493_v60 = vmul.f32 %v477_v56, %v477_v56  ;;  %v479_v61 = vunpack.c.h.bf16 %v253_v57 }
  0x82   : > { %576 = vadd.xlane.f32.xlu0 %v556_v19  ;;  %578 = vadd.xlane.f32.xlu1 %v557_v20  ;;  %v494_v62 = vmul.f32 %v478_v59, %v478_v59  ;;  %v480_v63 = vunpack.c.l.bf16 %v1525_v13  ;;  %v481_v3 = vunpack.c.h.bf16 %v1525_v13  ;;  %v482_v6 = vunpack.c.l.bf16 %v257_v4 }
  0x83   : > { %v495_v0 = vmul.f32 %v479_v61, %v479_v61  ;;  %v483_v8 = vunpack.c.h.bf16 %v257_v4  ;;  %v485_v13 = vunpack.c.h.bf16 %v259_v9  ;;  %v486_v16 = vunpack.c.l.bf16 %v261_v14 }
  0x84   : > { %v496_v5 = vmul.f32 %v480_v63, %v480_v63  ;;  %v497_v7 = vmul.f32 %v481_v3, %v481_v3  ;;  %v498_v10 = vmul.f32 %v482_v6, %v482_v6  ;;  %vm698_vm2 = vcmask (!%p935_p0), 1040384  }
  0x85   : > { %v499_v12 = vmul.f32 %v483_v8, %v483_v8  ;;  %v501_v17 = vmul.f32 %v485_v13, %v485_v13  ;;  %v502_v19 = vmul.f32 %v486_v16, %v486_v16  ;;  %vm709_vm3 = vcmp.eq.s32.totalorder (!%p935_p0), %v1516_v1, 0 }
  0x86   : > { %580 = vadd.xlane.f32.xlu0 %v558_v24  ;;  %582 = vadd.xlane.f32.xlu1 %v559_v25  ;;  %vm710_vm4 = vcmp.eq.s32.totalorder (!%p935_p0), %v1518_v2, 1 }
  0x87   : > { %964 = vmatpush3.bf16.xpose.msra.mxu0 %v267_v11  ;;  %1001 = vmatpush3.bf16.xpose.msra.mxu1 %v267_v11  ;;  %v484_v11 = vunpack.c.l.bf16 %v259_v9  ;;  %vm711_vm5 = vmand (!%p935_p0), %vm709_vm3, %vm710_vm4 }
  0x88   : > { %965 = vmatprep.subr.bf16.mxu0 %v269_v18  ;;  %994 = vmatprep.subr.bf16.mxu1 %v269_v18 }
  0x89   : > { %v500_v15 = vmul.f32 %v484_v11, %v484_v11 }
  0x8a   : > { %584 = vadd.xlane.f32.xlu0 %v560_v29  ;;  %586 = vadd.xlane.f32.xlu1 %v561_v30 }
  0x8e   : > { %588 = vadd.xlane.f32.xlu0 %v562_v34  ;;  %590 = vadd.xlane.f32.xlu1 %v563_v35 }
  0x8f   : > { %966 = vmatpush3.bf16.xpose.msra.mxu0 %v269_v18  ;;  %1002 = vmatpush3.bf16.xpose.msra.mxu1 %v269_v18  ;;  %v487_v18 = vunpack.c.h.bf16 %v261_v14 }
  0x90   : > { %967 = vmatprep.subr.bf16.mxu0 %v271_v23  ;;  %995 = vmatprep.subr.bf16.mxu1 %v271_v23 }
  0x91   : > { %v503_v20 = vmul.f32 %v487_v18, %v487_v18 }
  0x92   : > { %592 = vadd.xlane.f32.xlu0 %v564_v39  ;;  %594 = vadd.xlane.f32.xlu1 %v565_v40 }
  0x96   : > { %596 = vadd.xlane.f32.xlu0 %v566_v43  ;;  %598 = vadd.xlane.f32.xlu1 %v567_v44 }
  0x97   : > { %968 = vmatpush3.bf16.xpose.msra.mxu0 %v271_v23  ;;  %1003 = vmatpush3.bf16.xpose.msra.mxu1 %v271_v23 }
  0x98   : > { %969 = vmatprep.subr.bf16.mxu0 %v273_v28  ;;  %996 = vmatprep.subr.bf16.mxu1 %v273_v28 }
  0x9a   : > { %504 = vadd.xlane.f32.xlu0 %v488_v48  ;;  %506 = vadd.xlane.f32.xlu1 %v489_v50 }
  0x9e   : > { %508 = vadd.xlane.f32.xlu0 %v490_v53  ;;  %510 = vadd.xlane.f32.xlu1 %v491_v55 }
  0x9f   : > { %970 = vmatpush3.bf16.xpose.msra.mxu0 %v273_v28  ;;  %1004 = vmatpush3.bf16.xpose.msra.mxu1 %v273_v28 }
  0xa0   : > { %971 = vmatprep.subr.bf16.mxu0 %v1533_v33  ;;  %997 = vmatprep.subr.bf16.mxu1 %v1533_v33 }
  0xa2   : > { %512 = vadd.xlane.f32.xlu0 %v492_v58  ;;  %514 = vadd.xlane.f32.xlu1 %v493_v60 }
  0xa6   : > { %516 = vadd.xlane.f32.xlu0 %v494_v62  ;;  %518 = vadd.xlane.f32.xlu1 %v495_v0 }
  0xa7   : > { %972 = vmatpush3.bf16.xpose.msra.mxu0 %v1533_v33  ;;  %1005 = vmatpush3.bf16.xpose.msra.mxu1 %v1533_v33 }
  0xa8   : > { %973 = vmatprep.subr.bf16.mxu0 %v1538_v38  ;;  %998 = vmatprep.subr.bf16.mxu1 %v1538_v38 }
  0xaa   : > { %520 = vadd.xlane.f32.xlu0 %v496_v5  ;;  %522 = vadd.xlane.f32.xlu1 %v497_v7 }
  0xae   : > { %524 = vadd.xlane.f32.xlu0 %v498_v10  ;;  %526 = vadd.xlane.f32.xlu1 %v499_v12 }
  0xaf   : > { %974 = vmatpush3.bf16.xpose.msra.mxu0 %v1538_v38  ;;  %1006 = vmatpush3.bf16.xpose.msra.mxu1 %v1538_v38 }
  0xb2   : > { %528 = vadd.xlane.f32.xlu0 %v500_v15  ;;  %530 = vadd.xlane.f32.xlu1 %v501_v17 }
  0xb6   : > { %532 = vadd.xlane.f32.xlu0 %v502_v19  ;;  %534 = vadd.xlane.f32.xlu1 %v503_v20 }
  0xb7   : > { %976 = vmatmul.mubr.bf16.vlgmr.msra.gmra.mrb[0].mxu0 %v1544_v47  ;;  %984 = vmatmul.mubr.bf16.vlgmr.msra.gmra.mrb[0].mxu1 %v257_v4 }
  0xb8   : > { %979 = vmatprep.mubr.bf16.mxu0 %v251_v52  ;;  %987 = vmatprep.mubr.bf16.mxu1 %v259_v9 }
  0xbf   : > { %980 = vmatmul.mubr.bf16.gmra.mrb[4].mxu0 %v253_v57  ;;  %988 = vmatmul.mubr.bf16.gmra.mrb[4].mxu1 %v261_v14 }
 0x107   : > { %v569_v21 = vpop.xlane.xlu0 %568  ;;  %v573_v23 = vpop.xlane.xlu1 %572 }
 0x108   : > { %600 = vxpose.xlu0.b32.start [1/16] (narrow) %v569_v21, 8 }
 0x10b   : > { %v571_v22 = vpop.xlane.xlu0 %570  ;;  %v575_v24 = vpop.xlane.xlu1 %574 }
 0x10c   : > { %601 = vxpose.xlu0.b32.cont [2/16] (narrow) %v571_v22, 8 }
 0x10f   : > { %v577_v25 = vpop.xlane.xlu0 %576  ;;  %v579_v26 = vpop.xlane.xlu1 %578 }
 0x110   : > { %602 = vxpose.xlu0.b32.cont [3/16] (narrow) %v573_v23, 8 }
 0x113   : > { %v581_v27 = vpop.xlane.xlu0 %580  ;;  %v583_v28 = vpop.xlane.xlu1 %582 }
 0x114   : > { %603 = vxpose.xlu0.b32.cont [4/16] (narrow) %v575_v24, 8 }
 0x117   : > { %v585_v29 = vpop.xlane.xlu0 %584  ;;  %v587_v30 = vpop.xlane.xlu1 %586 }
 0x118   : > { %604 = vxpose.xlu0.b32.cont [5/16] (narrow) %v577_v25, 8 }
 0x11b   : > { %v589_v31 = vpop.xlane.xlu0 %588  ;;  %v591_v32 = vpop.xlane.xlu1 %590 }
 0x11c   : > { %605 = vxpose.xlu0.b32.cont [6/16] (narrow) %v579_v26, 8 }
 0x11f   : > { %v593_v33 = vpop.xlane.xlu0 %592  ;;  %v595_v34 = vpop.xlane.xlu1 %594 }
 0x120   : > { %606 = vxpose.xlu0.b32.cont [7/16] (narrow) %v581_v27, 8 }
 0x123   : > { %v597_v35 = vpop.xlane.xlu0 %596  ;;  %v599_v36 = vpop.xlane.xlu1 %598 }
 0x124   : > { %607 = vxpose.xlu0.b32.cont [8/16] (narrow) %v583_v28, 8 }
 0x127   : > { %v505_v37 = vpop.xlane.xlu0 %504  ;;  %v507_v39 = vpop.xlane.xlu1 %506 }
 0x128   : > { %608 = vxpose.xlu0.b32.cont [9/16] (narrow) %v585_v29, 8 }
 0x12b   : > { %v509_v38 = vpop.xlane.xlu0 %508  ;;  %v511_v41 = vpop.xlane.xlu1 %510 }
 0x12c   : > { %609 = vxpose.xlu0.b32.cont [10/16] (narrow) %v587_v30, 8 }
 0x12f   : > { %v513_v40 = vpop.xlane.xlu0 %512  ;;  %v515_v43 = vpop.xlane.xlu1 %514 }
 0x130   : > { %610 = vxpose.xlu0.b32.cont [11/16] (narrow) %v589_v31, 8 }
 0x133   : > { %v517_v42 = vpop.xlane.xlu0 %516  ;;  %v519_v45 = vpop.xlane.xlu1 %518 }
 0x134   : > { %611 = vxpose.xlu0.b32.cont [12/16] (narrow) %v591_v32, 8 }
 0x137   : > { %v521_v44 = vpop.xlane.xlu0 %520  ;;  %v523_v47 = vpop.xlane.xlu1 %522 }
 0x138   : > { %612 = vxpose.xlu0.b32.cont [13/16] (narrow) %v593_v33, 8 }
 0x13b   : > { %v525_v46 = vpop.xlane.xlu0 %524  ;;  %v527_v49 = vpop.xlane.xlu1 %526 }
 0x13c   : > { %613 = vxpose.xlu0.b32.cont [14/16] (narrow) %v595_v34, 8 }
 0x13f   : > { %v529_v48 = vpop.xlane.xlu0 %528  ;;  %v531_v52 = vpop.xlane.xlu1 %530 }
 0x140   : > { %614 = vxpose.xlu0.b32.cont [15/16] (narrow) %v597_v35, 8 }
 0x143   : > { %v533_v50 = vpop.xlane.xlu0 %532  ;;  %v535_v15 = vpop.xlane.xlu1 %534 }
 0x144   : > { %615 = vxpose.xlu0.b32.end [16/16] (narrow) %v599_v36, 8 }
 0x188   : > { %v1559_v51 = vpop.trf.xlu0 }
 0x18a   : > { %v985_v53 = vpop.f32.mrb[0].mxu1  ;;  %v977_v54 = vpop.f32.mrb[0].mxu0 }
 0x18b   : > { %v642_v55 = vmul.f32 2.0, %v985_v53  ;;  %v634_v56 = vmul.f32 2.0, %v977_v54  ;;  %v409_v57 = vpop.f32.mrb[1].mxu0  ;;  %v441_v58 = vpop.f32.mrb[1].mxu1 }
 0x18c   : > { %v632_v59 = vmul.f32 2.0, %v409_v57  ;;  %v640_v60 = vmul.f32 2.0, %v441_v58  ;;  %v978_v61 = vpop.f32.mrb[2].mxu0  ;;  %v986_v62 = vpop.f32.mrb[2].mxu1 }
 0x18d   : > { %v1561_v63 = vsub.f32 %v525_v46, %v642_v55  ;;  %v1563_v0 = vsub.f32 %v509_v38, %v634_v56  ;;  %v635_v3 = vmul.f32 2.0, %v978_v61  ;;  %v643_v4 = vmul.f32 2.0, %v986_v62  ;;  %v412_v5 = vpop.f32.mrb[3].mxu0  ;;  %v444_v6 = vpop.f32.mrb[3].mxu1 }
 0x18e   : > { %v1565_v7 = vsub.f32 %v505_v37, %v632_v59  ;;  %v1567_v8 = vsub.f32 %v521_v44, %v640_v60  ;;  %v633_v9 = vmul.f32 2.0, %v412_v5  ;;  %v641_v10 = vmul.f32 2.0, %v444_v6 }
 0x18f   : > { %v1569_v11 = vsub.f32 %v511_v41, %v635_v3  ;;  %v1571_v12 = vsub.f32 %v527_v49, %v643_v4 }
 0x190   : > { %v1573_v13 = vsub.f32 %v507_v39, %v633_v9  ;;  %v1575_v14 = vsub.f32 %v523_v47, %v641_v10 }
 0x192   : > { %v989_v16 = vpop.f32.mrb[4].mxu1  ;;  %v981_v17 = vpop.f32.mrb[4].mxu0  ;;  %667 = sbr.rel (%p935_p0) target bundleno = 659 (0x293), region = 52 }
 0x193   : > { %v646_v18 = vmul.f32 2.0, %v989_v16  ;;  %v638_v19 = vmul.f32 2.0, %v981_v17  ;;  %v425_v20 = vpop.f32.mrb[5].mxu0  ;;  %v457_v21 = vpop.f32.mrb[5].mxu1 }
 0x194   : > { %v636_v22 = vmul.f32 2.0, %v425_v20  ;;  %v644_v23 = vmul.f32 2.0, %v457_v21  ;;  %v982_v24 = vpop.f32.mrb[6].mxu0  ;;  %v990_v25 = vpop.f32.mrb[6].mxu1 }
 0x195   : > { %v1577_v26 = vsub.f32 %v533_v50, %v646_v18  ;;  %v1579_v27 = vsub.f32 %v517_v42, %v638_v19  ;;  %v639_v28 = vmul.f32 2.0, %v982_v24  ;;  %v647_v29 = vmul.f32 2.0, %v990_v25  ;;  %v428_v30 = vpop.f32.mrb[7].mxu0  ;;  %v460_v31 = vpop.f32.mrb[7].mxu1 }
 0x196   : > { %v1581_v32 = vsub.f32 %v513_v40, %v636_v22  ;;  %v1583_v33 = vsub.f32 %v529_v48, %v644_v23  ;;  %v637_v34 = vmul.f32 2.0, %v428_v30  ;;  %v645_v35 = vmul.f32 2.0, %v460_v31 }
 0x197   : > { %v1585_v36 = vsub.f32 %v519_v45, %v639_v28  ;;  %v1587_v37 = vsub.f32 %v535_v15, %v647_v29  ;;  %v670_v42 = vmax.f32 (!%p935_p0), %v1563_v0, %v1579_v27 }
 0x198   : > { %v1589_v38 = vsub.f32 %v515_v43, %v637_v34  ;;  %v1591_v39 = vsub.f32 %v531_v52, %v645_v35  ;;  %v668_v40 = vmax.f32 (!%p935_p0), %v1565_v7, %v1581_v32 }
 0x199   : > { %v671_v43 = vmax.f32 %v1569_v11, %v1585_v36  ;;  %v674_v46 = vmax.f32 %v670_v42, %v1561_v63 }
 0x19a   : > { %v669_v41 = vmax.f32 %v1573_v13, %v1589_v38  ;;  %v672_v44 = vmax.f32 %v668_v40, %v1567_v8 }
 0x19b   : > { %v675_v47 = vmax.f32 %v671_v43, %v1571_v12  ;;  %v678_v50 = vmax.f32 %v674_v46, %v1577_v26 }
 0x19c   : > { %v673_v45 = vmax.f32 %v669_v41, %v1575_v14  ;;  %v676_v48 = vmax.f32 %v672_v44, %v1583_v33 }
 0x19d   : > { %v679_v52 = vmax.f32 %v675_v47, %v1587_v37 }
 0x19e   : > { %v677_v49 = vmax.f32 %v673_v45, %v1591_v39 }
 0x19f   : > { %v681_v54 = vmax.f32 %v678_v50, %v679_v52 }
 0x1a0   : > { %v680_v53 = vmax.f32 %v676_v48, %v677_v49 }
 0x1a2   : > { %v682_v55 = vmax.f32 %v680_v53, %v681_v54 }
 0x1a4   : > { %v683_v56 = vrot.slane %v682_v55, 4 }
 0x1a6   : > { %v684_v57 = vmax.f32 %v682_v55, %v683_v56 }
 0x1a8   : > { %v685_v58 = vrot.slane %v684_v57, 2 }
 0x1aa   : > { %v686_v59 = vmax.f32 %v684_v57, %v685_v58 }
 0x1ac   : > { %v687_v60 = vrot.slane %v686_v59, 1 }
 0x1ae   : > { %v688_v61 = vmax.f32 %v686_v59, %v687_v60 }
 0x1b0   : > { %v689_v62 = vadd.f32 %v688_v61, %v1559_v51 }
 0x1b2   : > { %v690_v3 = vmax.f32 %v689_v62, 0.0 }
 0x1b4   : > { %1114 = vrsqrt.f32 %v690_v3  ;;  %vm693_vm0 = vcmp.eq.f32.partialorder %v690_v3, inf  ;;  %v696_v5 = vand.u32 2147483648, %v690_v3  ;;  %vm695_vm1 = vcmp.eq.f32.partialorder %v690_v3, 0.0 }
 0x1be   : > { %v1115_v4 = vpop.eup %1114 }
 0x1bf   : > { %v692_v6 = vmul.f32 %v1115_v4, %v690_v3 }
 0x1c1   : > { %v694_v9 = vsel %vm693_vm0, %v690_v3, %v692_v6 }
 0x1c2   : > { %v697_v10 = vsel %vm695_vm1, %v696_v5, %v694_v9 }
 0x1c3   : > { %v699_v15 = vsel %vm698_vm2, %v697_v10, 0.0 }
 0x1c4   : > { %700 = vadd.xlane.f32.xlu0 %v699_v15 }
 0x251   : > { %v701_v16 = vpop.xlane.xlu0 %700 }
 0x252   : > { %v702_v17 = vrot.slane %v701_v16, 4 }
 0x254   : > { %v703_v18 = vadd.f32 %v702_v17, %v701_v16 }
 0x256   : > { %v704_v19 = vrot.slane %v703_v18, 2 }
 0x258   : > { %v705_v20 = vadd.f32 %v704_v19, %v703_v18 }
 0x25a   : > { %v706_v21 = vrot.slane %v705_v20, 1 }
 0x25c   : > { %v707_v22 = vadd.f32 %v706_v21, %v705_v20 }
 0x25e   : > { %1007 = vpush %v707_v22 }
 0x28f   : > { %s1008_s30 = spop %1007 }
 0x290   : > { %v712_v23 = vstv %s1008_s30 }
 0x291   : > { %v713_v24 = vsel %vm711_vm5, %v712_v23, 0.0 }
 0x292   : > { %714 = vst [vmem:[%s1595_s26] sm:$0xff] %v713_v24 }
 0x293 PF: > { %p936_p7 = scmp.lt.s32.totalorder %s1336_s19, 1 }
 0x294   : > { %v719_v25 = vmin.f32 (!%p936_p7), %v1565_v7, %v1581_v32  ;;  %v720_v28 = vmin.f32 (!%p936_p7), %v1573_v13, %v1589_v38  ;;  %v721_v29 = vmin.f32 (!%p936_p7), %v1563_v0, %v1579_v27  ;;  %v722_v30 = vmin.f32 (!%p936_p7), %v1569_v11, %v1585_v36 }
 0x295   : > { %718 = sbr.rel (%p936_p7) target bundleno = 913 (0x391), region = 56  ;;  %vm751_vm8 = vcmask (!%p936_p7), 1040384   ;;  %vm762_vm9 = vcmp.eq.s32.totalorder (!%p936_p7), %v1516_v1, 0  ;;  %vm763_vm10 = vcmp.eq.s32.totalorder (!%p936_p7), %v1518_v2, 1 }
 0x296   : > { %v723_v31 = vmin.f32 (!%p936_p7), %v719_v25, %v1567_v8  ;;  %v724_v34 = vmin.f32 (!%p936_p7), %v720_v28, %v1575_v14  ;;  %v725_v35 = vmin.f32 (!%p936_p7), %v721_v29, %v1561_v63  ;;  %v726_v40 = vmin.f32 (!%p936_p7), %v722_v30, %v1571_v12  ;;  %vm764_vm11 = vmand (!%p936_p7), %vm762_vm9, %vm763_vm10 }
 0x298   : > { %v727_v41 = vmin.f32 (!%p936_p7), %v723_v31, %v1583_v33  ;;  %v728_v7 = vmin.f32 (!%p936_p7), %v724_v34, %v1591_v39  ;;  %v729_v13 = vmin.f32 (!%p936_p7), %v725_v35, %v1577_v26  ;;  %v730_v32 = vmin.f32 (!%p936_p7), %v726_v40, %v1587_v37 }
 0x29a   : > { %v731_v0 = vmin.f32 (!%p936_p7), %v727_v41, %v728_v7  ;;  %v732_v27 = vmin.f32 (!%p936_p7), %v729_v13, %v730_v32 }
 0x29c   : > { %v733_v38 = vmin.f32 %v731_v0, %v732_v27 }
 0x29e   : > { %v734_v11 = vrot.slane %v733_v38, 4 }
 0x2a0   : > { %v735_v36 = vmin.f32 %v733_v38, %v734_v11 }
 0x2a2   : > { %v736_v8 = vrot.slane %v735_v36, 2 }
 0x2a4   : > { %v737_v42 = vmin.f32 %v735_v36, %v736_v8 }
 0x2a6   : > { %v738_v14 = vrot.slane %v737_v42, 1 }
 0x2a8   : > { %v739_v43 = vmin.f32 %v737_v42, %v738_v14 }
 0x2aa   : > { %v740_v63 = vadd.f32 %v739_v43, %v1559_v51 }
 0x2ac   : > { %v741_v12 = vmax.f32 %v740_v63, 0.0 }
 0x2ae   : > { %1116 = vrsqrt.f32 %v741_v12  ;;  %vm744_vm6 = vcmp.eq.f32.partialorder %v741_v12, inf  ;;  %v747_v39 = vand.u32 2147483648, %v741_v12  ;;  %vm746_vm7 = vcmp.eq.f32.partialorder %v741_v12, 0.0 }
 0x2b8   : > { %v1117_v33 = vpop.eup %1116 }
 0x2b9   : > { %v743_v44 = vmul.f32 %v1117_v33, %v741_v12 }
 0x2bb   : > { %v745_v26 = vsel %vm744_vm6, %v741_v12, %v743_v44 }
 0x2bc   : > { %v748_v37 = vsel %vm746_vm7, %v747_v39, %v745_v26 }
 0x2bd   : > { %v749_v45 = vsub.f32 100.0, %v748_v37 }
 0x2bf   : > { %v750_v46 = vmax.f32 %v749_v45, 0.0 }
 0x2c1   : > { %v752_v47 = vsel %vm751_vm8, %v750_v46, 0.0 }
 0x2c2   : > { %753 = vadd.xlane.f32.xlu0 %v752_v47 }
 0x34f   : > { %v754_v48 = vpop.xlane.xlu0 %753 }
 0x350   : > { %v755_v49 = vrot.slane %v754_v48, 4 }
 0x352   : > { %v756_v50 = vadd.f32 %v755_v49, %v754_v48 }
 0x354   : > { %v757_v52 = vrot.slane %v756_v50, 2 }
 0x356   : > { %v758_v51 = vadd.f32 %v757_v52, %v756_v50 }
 0x358   : > { %v759_v53 = vrot.slane %v758_v51, 1 }
 0x35a   : > { %v760_v54 = vadd.f32 %v759_v53, %v758_v51 }
 0x35c   : > { %1009 = vpush %v760_v54 }
 0x38d   : > { %s1010_s9 = spop %1009 }
 0x38e   : > { %v765_v55 = vstv %s1010_s9 }
 0x38f   : > { %v766_v56 = vsel %vm764_vm11, %v765_v55, 0.0 }
 0x390   : > { %767 = vst [vmem:[%s1595_s26] sm:$0xff] %v766_v56 }
 0x391 PF: > { %p1718_p2 = scmp.ne.s32.totalorder %s1336_s19, 0 }
 0x392   : > { %v772_v57 = vld [vmem:[#allocation2] sm:$0x3] (!%p1718_p2)  ;;  %vm788_vm12 = vcmask (!%p1718_p2), 1041408   ;;  %vm785_vm13 = vcmp.eq.s32.totalorder (!%p1718_p2), %v1516_v1, 0  ;;  %vm786_vm14 = vcmp.eq.s32.totalorder (!%p1718_p2), %v1518_v2, 0 }
 0x393   : > { %771 = sbr.rel (%p1718_p2) target bundleno = 1157 (0x485), region = 60  ;;  %v777_v58 = vand.u32 (!%p1718_p2), 2147483647, %v772_v57  ;;  %v773_v3 = vld [vmem:[%s1692_s1] sm:$0x3] (!%p1718_p2)  ;;  %v774_v4 = vmax.f32 (!%p1718_p2), %v772_v57, 0.0  ;;  %vm787_vm15 = vmand (!%p1718_p2), %vm785_vm13, %vm786_vm14 }
 0x394   : > { %v775_v5 = vmul.f32 (!%p1718_p2), %v773_v3, %v772_v57 }
 0x395   : > { %v778_v59 = vsub.f32 (!%p1718_p2), 0.0, %v777_v58 }
 0x396   : > { %v776_v6 = vsub.f32 (!%p1718_p2), %v774_v4, %v775_v5 }
 0x397   : > { %v779_v60 = vmul.f32 (!%p1718_p2), 1.442695, %v778_v59  ;;  %v799_v24 = vld [vmem:[%s1595_s26] sm:$0xff] (!%p1718_p2) }
 0x399   : > { %1118 = vpow2.f32 (!%p1718_p2), %v779_v60 }
 0x3a3   : > { %v1119_v61 = vpop.eup %1118 }
 0x3a4   : > { %v781_v62 = vadd.f32 1.0, %v1119_v61 }
 0x3a6   : > { %1120 = vlog2.f32 %v781_v62 }
 0x3b0   : > { %v1121_v9 = vpop.eup %1120 }
 0x3b1   : > { %v783_v10 = vmul.f32 0.6931472, %v1121_v9 }
 0x3b3   : > { %v784_v15 = vadd.f32 %v783_v10, %v776_v6 }
 0x3b5   : > { %v789_v16 = vsel %vm788_vm12, %v784_v15, 0.0 }
 0x3b6   : > { %790 = vadd.xlane.f32.xlu0 %v789_v16 }
 0x443   : > { %v791_v17 = vpop.xlane.xlu0 %790 }
 0x444   : > { %v792_v18 = vrot.slane %v791_v17, 4 }
 0x446   : > { %v793_v19 = vadd.f32 %v792_v18, %v791_v17 }
 0x448   : > { %v794_v20 = vrot.slane %v793_v19, 2 }
 0x44a   : > { %v795_v21 = vadd.f32 %v794_v20, %v793_v19 }
 0x44c   : > { %v796_v22 = vrot.slane %v795_v21, 1 }
 0x44e   : > { %v797_v23 = vadd.f32 %v796_v22, %v795_v21 }
 0x450   : > { %1011 = vpush %v797_v23 }
 0x481   : > { %s1012_s14 = spop %1011 }
 0x482   : > { %v800_v25 = vstv %s1012_s14 }
 0x483   : > { %v801_v28 = vsel %vm787_vm15, %v800_v25, %v799_v24 }
 0x484   : > { %802 = vst [vmem:[%s1595_s26] sm:$0xff] %v801_v28 }
 0x485 PF: > { %s939_s22 = sshll.u32 %s1336_s19, 7  ;;  %s817_s25 = sshll.u32 %s1595_s26, 4  ;;  %s818_s25 = int_to_ptr.vmem [resolvable:$true] %s817_s25 }
 0x486   : > { %s1652_s23 = scalar_lea.hbm %s1695_s4, %s939_s22  ;;  %s804_s6 = scalar_lea.sflag [#allocation4], %s1506_s0 }
 0x487   : > { %s1208_s7 = scalar_lea.vmem %s818_s25, 128  ;;  %p1719_p6 = scmp.ne.s32.totalorder %s1704_s27, 0 }
 0x488   : > { %p1209_p11 = scmp.ne.s32.totalorder %s818_s25, %s1208_s7  ;;  %s1289_s29 = smov [#allocation8]  }
 0x489   : > { %s1212_s10 = sshll.u32 %s1289_s29, 4  ;;  %s1213_s10 = int_to_ptr.vmem [resolvable:$false] %s1212_s10 }
 0x48a   : > { %p1210_p13 = pnand %p1209_p11, %p1719_p6  ;;  %s1214_s11 = scalar_lea.vmem %s1213_s10, 256 }
 0x48b   : > { %p1215_p4 = scmp.lt.s32.totalorder %s818_s25, %s1213_s10  ;;  %p1216_p12 = scmp.lt.s32.totalorder %s1214_s11, %s1208_s7 }
 0x48c   : > { %p1211_p3 = pneg %p1210_p13 }
 0x48d   : > { %p1217_p1 = por %p1216_p12, %p1215_p4 }
 0x48f   : > { %p1218_p5 = pnand %p1217_p1, %p1211_p3 }
 0x491   : > { %1221 = shalt.err (!%p1218_p5)
}
 0x492   : > { %s1222_s19 = scalar_lea.hbm %s1652_s23, 128  ;;  %s1226_s26 = scalar_lea.hbm %s1695_s4, 256 }
 0x493   : > { %p1223_p9 = scmp.ne.s32.totalorder %s1652_s23, %s1222_s19  ;;  %p1227_p0 = scmp.lt.u32.totalorder %s1652_s23, %s1695_s4 }
 0x494   : > { %p1228_p7 = scmp.lt.u32.totalorder %s1226_s26, %s1222_s19  ;;  %p1230_p11 = scmp.lt.u32.totalorder %s1222_s19, %s1652_s23 }
 0x495   : > { %p1224_p10 = pnand %p1223_p9, %p1719_p6 }
 0x496   : > { %p1229_p2 = por %p1228_p7, %p1227_p0 }
 0x497   : > { %p1225_p8 = pneg %p1224_p10 }
 0x498   : > { %p1231_p13 = por %p1230_p11, %p1229_p2 }
 0x49a   : > { %p1232_p3 = pnand %p1231_p13, %p1225_p8 }
 0x49c   : > { %1235 = shalt.err (!%p1232_p3)
}
 0x49d   : > { %1023 = dma.vmem_to_hbm [thread:$0]  (%p1719_p6), %s818_s25, 128, %s1652_s23, %s804_s6  }
 0x49e PF: > { %s829_s12 = sand.u32 1, %s1270_s15   ;;  %p1720_p4 = scmp.ne.s32.totalorder %s1705_s28, 0 }
 0x49f   : > { %p1721_p12 = scmp.ge.s32.totalorder %s1282_s18, 2  ;;  %s830_s13 = scalar_lea.sflag [#allocation4], %s829_s12 }
 0x4a1   : > { %p1037_p1 = pnand %p1721_p12, %p1720_p4 }
 0x4a3   : > { %1265 = dma.done.wait (!%p1037_p1), %s830_s13, 128  }
 0x4a4   : > { %1267 = vsyncadd (!%p1037_p1), %s830_s13, 4294967168  ;;  %p16_p5 = scmp.ge.s32.totalorder %s1340_s21, 4   ;;  %s1722_s15 = smov %s1274_s16 }
 0x4a5   : > { %s1723_s16 = smov %s1278_s17  ;;  %s1724_s17 = smov %s1352_s24 }
 0x4a6   : > { %s1725_s18 = smov %s1340_s21  ;;  %18 = sbr.rel (!%p16_p5) target bundleno = 7 (0x7), region = 100 }
 0x4ad   :  { %835 = vsyncpa [#allocation3], 1 }
 0x4ae   :  { %837 = vsyncpa [#allocation3 + $0x1], 1 }
 0x4af   :  { %838 = vsyncpa [#allocation6], 1 }
 0x4b0   :  { %839 = vsyncpa [#allocation4], 1 }
 0x4b1   :  { %841 = vsyncpa [#allocation4 + $0x1], 1 }

</bundles_post_ra>
